<compile_context>
chip_gen: v7x
topology: tpu7x:2x2x1
jax: 0.10.0
libtpu: 0.0.40
codegen_flags: <defaults>
</compile_context>

<pallas_src>
import functools

import jax
import jax.numpy as jnp
from jax import lax
from jax.experimental import pallas as pl
from jax.experimental.pallas import tpu as pltpu

_EPS = 1e-8
_SUBLANES = 8
_LANES = 128


def _dissim_kernel(z_ref, c_ref, out_ref, *, block_p, total_p):
    # z_ref:   (Pb, B, D) block of stacked patch embeddings (native dtype)
    # c_ref:   (B, D) f32, c[i] = sum_j an[j] - an[i]   (resident, grid-invariant)
    # out_ref: (8, 128) f32 per-core accumulator block (resident across axis 1)
    s = pl.program_id(1)

    @pl.when(s == 0)
    def _init():
        out_ref[...] = jnp.zeros_like(out_ref)

    # Global patch-block index (unclamped; the z index_map clamps the DMA).
    g = pl.program_id(0) * pl.num_programs(1) + s

    z = z_ref[...].astype(jnp.float32)                  # (Pb, B, D)
    c = c_ref[...]                                      # (B, D)

    dot = jnp.sum(z * c[None, :, :], axis=-1)           # (Pb, B)  z[p,i] . c[i]
    ssq = jnp.sum(z * z, axis=-1)                       # (Pb, B)  ||z[p,i]||^2
    contrib = dot * lax.rsqrt(jnp.maximum(ssq, jnp.float32(_EPS * _EPS)))

    # Mask rows past the true patch count (tail block / clamped OOB block).
    row = g * block_p + lax.broadcasted_iota(jnp.int32, contrib.shape, 0)
    contrib = jnp.where(row < total_p, contrib, 0.0)

    # One vreg worth of accumulator; every element holds the per-core sum.
    out_ref[...] += jnp.full(out_ref.shape, jnp.sum(contrib), jnp.float32)


def _pick_block_p(P, B, D, in_itemsize, budget_bytes=20 * 1024 * 1024):
    """Largest patch block whose *real* VMEM footprint fits the budget.

    Counts the double-buffered native-dtype input block plus ~3 f32
    (Pb, B, D)-shaped intermediates created by the in-kernel upcast and
    elementwise temporaries.  No divisibility requirement on P.
    """
    per_p = B * D * (2 * in_itemsize + 3 * 4)
    return int(max(1, min(P, budget_bytes // max(per_p, 1))))


def dissimilarity_loss_from_stacked(z, *, block_p=None, num_splits=None):
    """z: (P, B, D) stacked patch embeddings, any float dtype (bf16 recommended)."""
    P, B, D = z.shape

    # Tiny (B, D) preprocessing: L2-normalized mean folded into c[i] = an_sum - an[i].
    z_avg = jnp.mean(z, axis=0, dtype=jnp.float32)                        # (B, D)
    an = z_avg * lax.rsqrt(
        jnp.maximum(jnp.sum(z_avg * z_avg, axis=-1, keepdims=True),
                    jnp.float32(_EPS * _EPS)))
    c = jnp.sum(an, axis=0, keepdims=True) - an                           # (B, D) f32

    # Tiling: cdiv over P (masked tail), optional 2-way core split for v7x.
    if block_p is None:
        block_p = _pick_block_p(P, B, D, z.dtype.itemsize)
    block_p = max(1, min(int(block_p), P))
    total_blocks = pl.cdiv(P, block_p)
    if num_splits is None:
        num_splits = 2 if total_blocks >= 2 else 1   # v7x: 2 TCs; free on 1-TC chips
    num_splits = max(1, min(int(num_splits), total_blocks))
    steps = pl.cdiv(total_blocks, num_splits)

    kernel = functools.partial(_dissim_kernel, block_p=block_p, total_p=P)

    def z_index_map(cc, s):
        # Clamp so the DMA never starts past the last real block; rows past P
        # are zeroed inside the kernel by the validity mask.
        return (jnp.minimum(cc * steps + s, total_blocks - 1), 0, 0)

    partial_sums = pl.pallas_call(
        kernel,
        out_shape=jax.ShapeDtypeStruct((_SUBLANES * num_splits, _LANES), jnp.float32),
        grid_spec=pltpu.PrefetchScalarGridSpec(
            num_scalar_prefetch=0,
            grid=(num_splits, steps),
            in_specs=[
                pl.BlockSpec((block_p, B, D), z_index_map),
                pl.BlockSpec((B, D), lambda cc, s: (0, 0)),
            ],
            out_specs=pl.BlockSpec((_SUBLANES, _LANES), lambda cc, s: (cc, 0)),
        ),
        compiler_params=pltpu.CompilerParams(
            dimension_semantics=("parallel", "arbitrary"),
            vmem_limit_bytes=40 * 1024 * 1024,
        ),
    )(z, c)

    total = jnp.sum(partial_sums[::_SUBLANES, 0])      # one value per core split
    return total / jnp.float32(P * B * (B - 1)) - jnp.float32(1.0)


def dissimilarity_loss_efficiency(z_list, z_avg=None, **kw):
    """z_list: sequence of P arrays of shape (B, D). z_avg is ignored (as in PyTorch)."""
    del z_avg  # the PyTorch module recomputes the mean and ignores this argument
    z = jnp.stack(list(z_list), axis=0)   # (P, B, D), kept in its native dtype
    return dissimilarity_loss_from_stacked(z, **kw)


def _reference(z_stacked):
    # Independent pure-JAX reference mirroring the PyTorch module (explicit
    # cosine-similarity matrix + off-diagonal mask).
    z = z_stacked.astype(jnp.float32)
    P, B, D = z.shape
    z_avg = jnp.mean(z, axis=0)
    zn = z / jnp.maximum(jnp.linalg.norm(z, axis=-1, keepdims=True), _EPS)
    an = z_avg / jnp.maximum(jnp.linalg.norm(z_avg, axis=-1, keepdims=True), _EPS)
    cos = jnp.einsum("pid,jd->pij", zn, an) - 1.0
    mask = 1.0 - jnp.eye(B, dtype=jnp.float32)
    return jnp.sum(cos * mask[None, :, :]) / (P * B * (B - 1))


if __name__ == "__main__":
    key = jax.random.PRNGKey(0)
    P, B, D = 9, 16, 32   # num_patch (awkward on purpose), batch, feature dim
    keys = jax.random.split(key, P)
    z_list = [jax.random.normal(k, (B, D), dtype=jnp.float32) for k in keys]
    z = jnp.stack(z_list, axis=0)
    z_avg_dummy = jnp.mean(z, axis=0)   # ignored, like the PyTorch module

    ref = _reference(z)

    # 1) default tiling (single block, single split)
    loss = jax.block_until_ready(dissimilarity_loss_efficiency(z_list, z_avg_dummy))
    assert jnp.allclose(loss, ref, atol=1e-5, rtol=1e-5), (loss, ref)

    # 2) forced small block: exercises the multi-block grid, dual-core split,
    #    clamped tail block and the row-validity mask.
    loss2 = jax.block_until_ready(
        dissimilarity_loss_from_stacked(z, block_p=2, num_splits=2))
    assert jnp.allclose(loss2, ref, atol=1e-5, rtol=1e-5), (loss2, ref)

    # 3) bf16 activations (recommended production dtype; halves HBM traffic).
    z_bf16 = z.astype(jnp.bfloat16)
    ref_bf16 = _reference(z_bf16)
    loss3 = jax.block_until_ready(dissimilarity_loss_from_stacked(z_bf16))
    assert jnp.allclose(loss3, ref_bf16, atol=1e-3, rtol=1e-3), (loss3, ref_bf16)

    print("KERNEL_OK")
</pallas_src>

<mosaic_0001>
module attributes {stable_mosaic.version = 11 : i64} {
  func.func @_dissim_kernel(%arg0: i32, %arg1: i32, %arg2: memref<9x16x32xf32, #tpu.memory_space<vmem>>, %arg3: memref<16x32xf32, #tpu.memory_space<vmem>>, %arg4: memref<8x128xf32, #tpu.memory_space<vmem>>) attributes {dimension_semantics = [#tpu.dimension_semantics<parallel>, #tpu.dimension_semantics<arbitrary>], iteration_bounds = array<i64: 1, 1>, scalar_prefetch = 0 : i64, scratch_operands = 0 : i64, tpu.core_type = #tpu.core_type<tc>, window_params = [{transform_indices = @transform_0, window_bounds = array<i64: 9, 16, 32>}, {pipeline_mode = #tpu.pipeline_mode<synchronous>, transform_indices = @transform_1, window_bounds = array<i64: 16, 32>}, {transform_indices = @transform_2, window_bounds = array<i64: 8, 128>}]} {
    %c0_i32 = arith.constant 0 : i32
    %0 = arith.cmpi eq, %arg1, %c0_i32 : i32
    %1 = arith.extui %0 : i1 to i32
    %c0_i32_0 = arith.constant 0 : i32
    %2 = arith.cmpi ne, %1, %c0_i32_0 : i32
    scf.if %2 {
      %cst_14 = arith.constant 0.000000e+00 : f32
      %33 = vector.broadcast %cst_14 : f32 to vector<8x128xf32>
      %c0_15 = arith.constant 0 : index
      %c0_16 = arith.constant 0 : index
      %34 = vector.load %arg4[%c0_15, %c0_16] : memref<8x128xf32, #tpu.memory_space<vmem>>, vector<8x128xf32>
      tpu.vector_store %arg4[%c0_15, %c0_16], %33 {strides = array<i32>} : memref<8x128xf32, #tpu.memory_space<vmem>>, vector<8x128xf32>,
    } else {
    }
    %c1_i32 = arith.constant 1 : i32
    %3 = arith.muli %arg0, %c1_i32 : i32
    %4 = arith.addi %3, %arg1 : i32
    %c0 = arith.constant 0 : index
    %c0_1 = arith.constant 0 : index
    %c0_2 = arith.constant 0 : index
    %5 = vector.load %arg2[%c0, %c0_1, %c0_2] : memref<9x16x32xf32, #tpu.memory_space<vmem>>, vector<9x16x32xf32>
    %c0_3 = arith.constant 0 : index
    %c0_4 = arith.constant 0 : index
    %6 = vector.load %arg3[%c0_3, %c0_4] : memref<16x32xf32, #tpu.memory_space<vmem>>, vector<16x32xf32>
    %7 = vector.shape_cast %6 : vector<16x32xf32> to vector<1x16x32xf32>
    %8 = vector.broadcast %7 : vector<1x16x32xf32> to vector<9x16x32xf32>
    %9 = arith.mulf %5, %8 : vector<9x16x32xf32>
    %cst = arith.constant dense<0.000000e+00> : vector<9x16xf32>
    %10 = vector.multi_reduction <add>, %9, %cst [2] : vector<9x16x32xf32> to vector<9x16xf32>
    %11 = arith.mulf %5, %5 : vector<9x16x32xf32>
    %cst_5 = arith.constant dense<0.000000e+00> : vector<9x16xf32>
    %12 = vector.multi_reduction <add>, %11, %cst_5 [2] : vector<9x16x32xf32> to vector<9x16xf32>
    %cst_6 = arith.constant 1.000000e-16 : f32
    %13 = vector.broadcast %cst_6 : f32 to vector<9x16xf32>
    %14 = arith.maximumf %12, %13 : vector<9x16xf32>
    %15 = math.rsqrt %14 : vector<9x16xf32>
    %16 = arith.mulf %10, %15 : vector<9x16xf32>
    %c9_i32 = arith.constant 9 : i32
    %17 = arith.muli %4, %c9_i32 : i32
    %18 = tpu.iota {dimensions = array<i32: 0>} : vector<9x16xi32>
    %19 = vector.broadcast %17 : i32 to vector<9x16xi32>
    %20 = arith.addi %19, %18 : vector<9x16xi32>
    %c9_i32_7 = arith.constant 9 : i32
    %21 = vector.broadcast %c9_i32_7 : i32 to vector<9x16xi32>
    %22 = arith.cmpi slt, %20, %21 : vector<9x16xi32>
    %cst_8 = arith.constant 0.000000e+00 : f32
    %23 = vector.broadcast %cst_8 : f32 to vector<9x16xf32>
    %24 = arith.select %22, %16, %23 : vector<9x16xi1>, vector<9x16xf32>
    %c0_9 = arith.constant 0 : index
    %c0_10 = arith.constant 0 : index
    %25 = vector.load %arg4[%c0_9, %c0_10] : memref<8x128xf32, #tpu.memory_space<vmem>>, vector<8x128xf32>
    %26 = vector.shape_cast %24 : vector<9x16xf32> to vector<1x9x16xf32>
    %cst_11 = arith.constant dense<0.000000e+00> : vector<1xf32>
    %27 = vector.multi_reduction <add>, %26, %cst_11 [1, 2] : vector<1x9x16xf32> to vector<1xf32>
    %28 = vector.shape_cast %27 : vector<1xf32> to vector<1x1x1xf32>
    %29 = vector.extract %28[0, 0, 0] : f32 from vector<1x1x1xf32>
    %30 = vector.broadcast %29 : f32 to vector<8x128xf32>
    %31 = arith.addf %25, %30 : vector<8x128xf32>
    %c0_12 = arith.constant 0 : index
    %c0_13 = arith.constant 0 : index
    %32 = vector.load %arg4[%c0_12, %c0_13] : memref<8x128xf32, #tpu.memory_space<vmem>>, vector<8x128xf32>
    tpu.vector_store %arg4[%c0_12, %c0_13], %31 {strides = array<i32>} : memref<8x128xf32, #tpu.memory_space<vmem>>, vector<8x128xf32>,
    return
  }
  func.func @transform_0(%arg0: i32, %arg1: i32) -> (i32, i32, i32) {
    %c1_i32 = arith.constant 1 : i32
    %0 = arith.muli %arg0, %c1_i32 : i32
    %1 = arith.addi %0, %arg1 : i32
    %c0_i32 = arith.constant 0 : i32
    %2 = arith.minsi %1, %c0_i32 : i32
    %c0_i32_0 = arith.constant 0 : i32
    %c0_i32_1 = arith.constant 0 : i32
    %c0_i32_2 = arith.constant 0 : i32
    return %2, %c0_i32_0, %c0_i32_1 : i32, i32, i32
  }
  func.func @transform_1(%arg0: i32, %arg1: i32) -> (i32, i32) {
    %c0_i32 = arith.constant 0 : i32
    %c0_i32_0 = arith.constant 0 : i32
    %c0_i32_1 = arith.constant 0 : i32
    return %c0_i32, %c0_i32_0 : i32, i32
  }
  func.func @transform_2(%arg0: i32, %arg1: i32) -> (i32, i32) {
    %c0_i32 = arith.constant 0 : i32
    %c0_i32_0 = arith.constant 0 : i32
    return %arg0, %c0_i32 : i32, i32
  }
}

</mosaic_0001>

<bundles_post_ra>
// kernel: tpu_custom_call.1
= control target key start
LH: loop header
LB: loop body
LE: loop exit
PB: predicated region body
PF: predicated region fallthrough
CT: control target
= control target key end

     0   :  { %7 = vsyncpa [#allocation3], 0  ;;  %s777_s0 = inlined_call_operand.hbm [shape: f32[9,16,32], index: 0, kind: input, shape index: {}]   ;;  %s778_s1 = inlined_call_operand.hbm [shape: f32[16,32], index: 1, kind: input, shape index: {}]   ;;  %s779_s2 = inlined_call_operand.hbm [shape: f32[8,128], index: 2, kind: output, shape index: {}]  }
   0x1   :  { %8 = vsyncpa [#allocation6], 0 }
   0x2   :  { %9 = vsyncpa [#allocation4], 0  ;;  %s558_s9 = smov [#allocation2]   ;;  %s486_s13 = scalar_lea.hbm %s777_s0, 2304 }
   0x3   :  { %s22_s10 = sshll.u32 %s558_s9, 4  ;;  %p487_p0 = scmp.ne.s32.totalorder %s777_s0, %s486_s13  ;;  %s23_s10 = int_to_ptr.vmem [resolvable:$true] %s22_s10 }
   0x4   :  { %p490_p1 = scmp.lt.u32.totalorder %s486_s13, %s777_s0 }
   0x6   :  { %p492_p2 = pnand %p490_p1, %p487_p0 }
   0x8   :  { %495 = shalt.err (!%p492_p2)
}
   0x9   :  { %s496_s18 = scalar_lea.vmem %s23_s10, 2304  ;;  %p501_p4 = scmp.lt.s32.totalorder %s23_s10, %s23_s10 }
   0xa   :  { %p497_p3 = scmp.ne.s32.totalorder %s23_s10, %s496_s18  ;;  %p502_p5 = scmp.lt.s32.totalorder %s496_s18, %s496_s18 }
   0xc   :  { %p503_p6 = por %p502_p5, %p501_p4 }
   0xe   :  { %p504_p7 = pnand %p503_p6, %p497_p3 }
  0x10   :  { %507 = shalt.err (!%p504_p7)
}
  0x11   :  { %s559_s19 = smov 128   ;;  %s560_s20 = smov 8  }
  0x12   :  { %28 = dma.hbm_to_vmem [thread:$0]  %s777_s0, 2304, %s23_s10, [#allocation3], %s559_s19, %s559_s19, %s560_s20  }
  0x13   :  { %s561_s23 = smov [#allocation5]   ;;  %s508_s27 = scalar_lea.hbm %s778_s1, 256 }
  0x14   :  { %s34_s24 = sshll.u32 %s561_s23, 4  ;;  %p509_p8 = scmp.ne.s32.totalorder %s778_s1, %s508_s27  ;;  %s35_s24 = int_to_ptr.vmem [resolvable:$true] %s34_s24 }
  0x15   :  { %p512_p9 = scmp.lt.u32.totalorder %s508_s27, %s778_s1 }
  0x17   :  { %p514_p10 = pnand %p512_p9, %p509_p8 }
  0x19   :  { %517 = shalt.err (!%p514_p10)
}
  0x1a   :  { %s518_s4 = scalar_lea.vmem %s35_s24, 256  ;;  %p523_p12 = scmp.lt.s32.totalorder %s35_s24, %s35_s24 }
  0x1b   :  { %p519_p11 = scmp.ne.s32.totalorder %s35_s24, %s518_s4  ;;  %p524_p13 = scmp.lt.s32.totalorder %s518_s4, %s518_s4 }
  0x1d   :  { %p525_p0 = por %p524_p13, %p523_p12 }
  0x1f   :  { %p526_p1 = pnand %p525_p0, %p519_p11 }
  0x21   :  { %529 = shalt.err (!%p526_p1)
}
  0x22   :  { %40 = dma.hbm_to_vmem [thread:$0]  %s778_s1, 256, %s35_s24, [#allocation6], %s559_s19, %s559_s19, %s560_s20  }
  0x23   :  { %552 = dma.done.wait [#allocation3], 2304  }
  0x24   :  { %553 = vsyncadd [#allocation3], 4294964992 }
  0x25   :  { %554 = dma.done.wait [#allocation6], 256  }
  0x26   :  { %555 = vsyncadd [#allocation6], 4294967040  ;;  %v602_v0 = vld [vmem:[#allocation2 + $0x10] sm:$0xff]  ;;  %vm95_vm0 = vcmask 261120   ;;  %v604_v1 = vld [vmem:[#allocation2] sm:$0xff]  ;;  %vm314_vm1 = vcmask 130112  }
  0x27   :  { %v606_v2 = vld [vmem:[#allocation2 + $0x18] sm:$0xff]  ;;  %v152_v3 = vmul.f32 %v602_v0, %v602_v0  ;;  %v150_v4 = vmul.f32 %v604_v1, %v604_v1  ;;  %v614_v6 = vld [vmem:[#allocation2 + $0x8] sm:$0xff]  ;;  %v620_v9 = vld [vmem:[#allocation2 + $0x20] sm:$0xff]  ;;  %vm388_vm2 = vcmask 1041409   ;;  %vm390_vm3 = vcmask 1042434   ;;  %s562_s1 = smov [#allocation7]  }
  0x28   :  { %v153_v5 = vmul.f32 %v606_v2, %v606_v2  ;;  %v151_v7 = vmul.f32 %v614_v6, %v614_v6  ;;  %v618_v8 = vld [vmem:[#allocation2 + $0x28] sm:$0xff]  ;;  %v154_v15 = vmul.f32 %v620_v9, %v620_v9  ;;  %v630_v16 = vld [vmem:[#allocation2 + $0x38] sm:$0xff]  ;;  %v632_v17 = vld [vmem:[#allocation2 + $0x30] sm:$0xff]  ;;  %vm392_vm4 = vcmask 1043459   ;;  %s430_s6 = sshll.u32 %s562_s1, 4  ;;  %s431_s6 = int_to_ptr.vmem [resolvable:$true] %s430_s6 }
  0x29   :  { %v174_v10 = vsel %vm95_vm0, %v152_v3, 0.0  ;;  %v168_v11 = vsel %vm95_vm0, %v150_v4, 0.0  ;;  %v155_v14 = vmul.f32 %v618_v8, %v618_v8  ;;  %v157_v20 = vmul.f32 %v630_v16, %v630_v16  ;;  %v640_v22 = vld [vmem:[#allocation2 + $0x48] sm:$0xff]  ;;  %v642_v23 = vld [vmem:[#allocation2 + $0x40] sm:$0xff]  ;;  %v650_v28 = vld [vmem:[#allocation2 + $0x58] sm:$0xff]  ;;  %s530_s8 = scalar_lea.vmem %s431_s6, 128  ;;  %p535_p3 = scmp.lt.s32.totalorder %s431_s6, %s431_s6 }
  0x2a   :  { %175 = vadd.xlane.f32.xlu1 %v174_v10  ;;  %169 = vadd.xlane.f32.xlu0 %v168_v11  ;;  %v177_v12 = vsel %vm95_vm0, %v153_v5, 0.0  ;;  %v171_v13 = vsel %vm95_vm0, %v151_v7, 0.0  ;;  %v180_v19 = vsel %vm95_vm0, %v154_v15, 0.0  ;;  %v156_v21 = vmul.f32 %v632_v17, %v632_v17  ;;  %v652_v29 = vld [vmem:[#allocation2 + $0x50] sm:$0xff]  ;;  %v660_v34 = vld [vmem:[#allocation2 + $0x68] sm:$0xff]  ;;  %v662_v35 = vld [vmem:[#allocation2 + $0x60] sm:$0xff]  ;;  %p531_p2 = scmp.ne.s32.totalorder %s431_s6, %s530_s8  ;;  %p536_p4 = scmp.lt.s32.totalorder %s530_s8, %s530_s8 }
  0x2b   :  { %v183_v18 = vsel %vm95_vm0, %v155_v14, 0.0  ;;  %v189_v24 = vsel %vm95_vm0, %v157_v20, 0.0  ;;  %v159_v26 = vmul.f32 %v640_v22, %v640_v22  ;;  %v158_v27 = vmul.f32 %v642_v23, %v642_v23  ;;  %v670_v40 = vld [vmem:[#allocation2 + $0x78] sm:$0xff]  ;;  %v672_v41 = vld [vmem:[#allocation2 + $0x70] sm:$0xff]  ;;  %v74_v46 = vld [vmem:[#allocation2 + $0x88] sm:$0xff] }
  0x2c   :  { %v186_v25 = vsel %vm95_vm0, %v156_v21, 0.0  ;;  %v161_v32 = vmul.f32 %v650_v28, %v650_v28  ;;  %v160_v33 = vmul.f32 %v652_v29, %v652_v29  ;;  %v163_v38 = vmul.f32 %v660_v34, %v660_v34  ;;  %v73_v47 = vld [vmem:[#allocation2 + $0x80] sm:$0xff]  ;;  %v76_v52 = vld [vmem:[#allocation5 + $0x8] sm:$0xff]  ;;  %v75_v53 = vld [vmem:[#allocation5] sm:$0xff]  ;;  %p537_p5 = por %p536_p4, %p535_p3 }
  0x2d   :  { %v195_v30 = vsel %vm95_vm0, %v159_v26, 0.0  ;;  %v192_v31 = vsel %vm95_vm0, %v158_v27, 0.0  ;;  %v162_v39 = vmul.f32 %v662_v35, %v662_v35  ;;  %v165_v44 = vmul.f32 %v670_v40, %v670_v40 }
  0x2e   :  { %178 = vadd.xlane.f32.xlu1 %v177_v12  ;;  %172 = vadd.xlane.f32.xlu0 %v171_v13  ;;  %v201_v36 = vsel %vm95_vm0, %v161_v32, 0.0  ;;  %v198_v37 = vsel %vm95_vm0, %v160_v33, 0.0  ;;  %v207_v42 = vsel %vm95_vm0, %v163_v38, 0.0  ;;  %v164_v45 = vmul.f32 %v672_v41, %v672_v41  ;;  %p538_p6 = pnand %p537_p5, %p531_p2 }
  0x2f   :  { %v204_v43 = vsel %vm95_vm0, %v162_v39, 0.0  ;;  %v213_v48 = vsel %vm95_vm0, %v165_v44, 0.0  ;;  %v167_v50 = vmul.f32 %v74_v46, %v74_v46  ;;  %v166_v51 = vmul.f32 %v73_v47, %v73_v47 }
  0x30   :  { %v210_v49 = vsel %vm95_vm0, %v164_v45, 0.0  ;;  %v78_v56 = vmul.f32 %v76_v52, %v614_v6  ;;  %v77_v57 = vmul.f32 %v75_v53, %v604_v1  ;;  %v80_v60 = vmul.f32 %v76_v52, %v606_v2 }
  0x31   :  { %v219_v54 = vsel %vm95_vm0, %v167_v50, 0.0  ;;  %v216_v55 = vsel %vm95_vm0, %v166_v51, 0.0  ;;  %v79_v61 = vmul.f32 %v75_v53, %v602_v0  ;;  %v82_v3 = vmul.f32 %v76_v52, %v618_v8 }
  0x32   :  { %184 = vadd.xlane.f32.xlu1 %v183_v18  ;;  %181 = vadd.xlane.f32.xlu0 %v180_v19  ;;  %v99_v58 = vsel %vm95_vm0, %v78_v56, 0.0  ;;  %v96_v59 = vsel %vm95_vm0, %v77_v57, 0.0  ;;  %v105_v62 = vsel %vm95_vm0, %v80_v60, 0.0  ;;  %v81_v1 = vmul.f32 %v75_v53, %v620_v9 }
  0x33   :  { %v102_v63 = vsel %vm95_vm0, %v79_v61, 0.0  ;;  %v111_v4 = vsel %vm95_vm0, %v82_v3, 0.0  ;;  %v84_v2 = vmul.f32 %v76_v52, %v630_v16  ;;  %v83_v0 = vmul.f32 %v75_v53, %v632_v17 }
  0x34   :  { %v108_v5 = vsel %vm95_vm0, %v81_v1, 0.0  ;;  %v86_v8 = vmul.f32 %v76_v52, %v640_v22  ;;  %v85_v9 = vmul.f32 %v75_v53, %v642_v23  ;;  %v88_v12 = vmul.f32 %v76_v52, %v650_v28 }
  0x35   :  { %v117_v6 = vsel %vm95_vm0, %v84_v2, 0.0  ;;  %v114_v7 = vsel %vm95_vm0, %v83_v0, 0.0  ;;  %v87_v13 = vmul.f32 %v75_v53, %v652_v29  ;;  %v90_v16 = vmul.f32 %v76_v52, %v660_v34 }
  0x36   :  { %190 = vadd.xlane.f32.xlu1 %v189_v24  ;;  %187 = vadd.xlane.f32.xlu0 %v186_v25  ;;  %v123_v10 = vsel %vm95_vm0, %v86_v8, 0.0  ;;  %v120_v11 = vsel %vm95_vm0, %v85_v9, 0.0  ;;  %v129_v14 = vsel %vm95_vm0, %v88_v12, 0.0  ;;  %v89_v17 = vmul.f32 %v75_v53, %v662_v35 }
  0x37   :  { %v126_v15 = vsel %vm95_vm0, %v87_v13, 0.0  ;;  %v135_v18 = vsel %vm95_vm0, %v90_v16, 0.0  ;;  %v92_v20 = vmul.f32 %v76_v52, %v670_v40  ;;  %v91_v21 = vmul.f32 %v75_v53, %v672_v41 }
  0x38   :  { %v132_v19 = vsel %vm95_vm0, %v89_v17, 0.0  ;;  %v94_v24 = vmul.f32 %v76_v52, %v74_v46  ;;  %v93_v25 = vmul.f32 %v75_v53, %v73_v47  ;;  %v277_v61 = vlaneseq }
  0x39   :  { %v141_v22 = vsel %vm95_vm0, %v92_v20, 0.0  ;;  %v138_v23 = vsel %vm95_vm0, %v91_v21, 0.0  ;;  %vm394_vm5 = vcmask 1044484   ;;  %vm396_vm6 = vcmask 1045509  }
  0x3a   :  { %196 = vadd.xlane.f32.xlu1 %v195_v30  ;;  %193 = vadd.xlane.f32.xlu0 %v192_v31  ;;  %v147_v26 = vsel %vm95_vm0, %v94_v24, 0.0  ;;  %v144_v27 = vsel %vm95_vm0, %v93_v25, 0.0  ;;  %v304_v2 = vand.u32 127, %v277_v61  ;;  %v722_v13 = vshrl.u32 %v277_v61, 7 }
  0x3b   :  { %vm398_vm7 = vcmask 1046534   ;;  %vm400_vm8 = vcmask 1047559   ;;  %vm407_vm10 = vcmask 130048   ;;  %vm409_vm11 = vcmask 122880  }
  0x3c   :  { %v730_v24 = vsub.s32 %v304_v2, %v722_v13 }
  0x3e   :  { %202 = vadd.xlane.f32.xlu1 %v201_v36  ;;  %199 = vadd.xlane.f32.xlu0 %v198_v37 }
  0x42   :  { %208 = vadd.xlane.f32.xlu1 %v207_v42  ;;  %205 = vadd.xlane.f32.xlu0 %v204_v43 }
  0x46   :  { %214 = vadd.xlane.f32.xlu1 %v213_v48  ;;  %211 = vadd.xlane.f32.xlu0 %v210_v49 }
  0x4a   :  { %220 = vadd.xlane.f32.xlu1 %v219_v54  ;;  %217 = vadd.xlane.f32.xlu0 %v216_v55 }
  0x4e   :  { %100 = vadd.xlane.f32.xlu1 %v99_v58  ;;  %97 = vadd.xlane.f32.xlu0 %v96_v59 }
  0x52   :  { %106 = vadd.xlane.f32.xlu1 %v105_v62  ;;  %103 = vadd.xlane.f32.xlu0 %v102_v63 }
  0x56   :  { %112 = vadd.xlane.f32.xlu1 %v111_v4  ;;  %109 = vadd.xlane.f32.xlu0 %v108_v5 }
  0x5a   :  { %118 = vadd.xlane.f32.xlu1 %v117_v6  ;;  %115 = vadd.xlane.f32.xlu0 %v114_v7 }
  0x5e   :  { %124 = vadd.xlane.f32.xlu1 %v123_v10  ;;  %121 = vadd.xlane.f32.xlu0 %v120_v11 }
  0x62   :  { %130 = vadd.xlane.f32.xlu1 %v129_v14  ;;  %127 = vadd.xlane.f32.xlu0 %v126_v15  ;;  %v309_v14 = vadd.s32 4294967288, %v304_v2 }
  0x66   :  { %136 = vadd.xlane.f32.xlu1 %v135_v18  ;;  %133 = vadd.xlane.f32.xlu0 %v132_v19 }
  0x6a   :  { %142 = vadd.xlane.f32.xlu1 %v141_v22  ;;  %139 = vadd.xlane.f32.xlu0 %v138_v23  ;;  %v727_v23 = vsub.s32 %v309_v14, %v722_v13 }
  0x6e   :  { %148 = vadd.xlane.f32.xlu1 %v147_v26  ;;  %145 = vadd.xlane.f32.xlu0 %v144_v27 }
  0xb7   :  { %v176_v28 = vpop.xlane.xlu1 %175  ;;  %v170_v29 = vpop.xlane.xlu0 %169 }
  0xb8   :  { %v224_v46 = vmax.f32 %v176_v28, 1e-16  ;;  %v222_v47 = vmax.f32 %v170_v29, 1e-16 }
  0xba   :  { %450 = vrsqrt.f32 %v224_v46 }
  0xbb   :  { %v179_v30 = vpop.xlane.xlu1 %178  ;;  %v173_v31 = vpop.xlane.xlu0 %172  ;;  %452 = vrsqrt.f32 %v222_v47 }
  0xbc   :  { %v225_v48 = vmax.f32 %v179_v30, 1e-16  ;;  %v223_v49 = vmax.f32 %v173_v31, 1e-16 }
  0xbe   :  { %454 = vrsqrt.f32 %v225_v48 }
  0xbf   :  { %v185_v32 = vpop.xlane.xlu1 %184  ;;  %v182_v33 = vpop.xlane.xlu0 %181  ;;  %456 = vrsqrt.f32 %v223_v49 }
  0xc0   :  { %v227_v52 = vmax.f32 %v185_v32, 1e-16  ;;  %v226_v53 = vmax.f32 %v182_v33, 1e-16 }
  0xc2   :  { %458 = vrsqrt.f32 %v227_v52 }
  0xc3   :  { %v191_v34 = vpop.xlane.xlu1 %190  ;;  %v188_v35 = vpop.xlane.xlu0 %187  ;;  %460 = vrsqrt.f32 %v226_v53 }
  0xc4   :  { %v229_v54 = vmax.f32 %v191_v34, 1e-16  ;;  %v228_v55 = vmax.f32 %v188_v35, 1e-16  ;;  %v451_v5 = vpop.eup %450 }
  0xc5   :  { %v453_v0 = vpop.eup %452 }
  0xc6   :  { %462 = vrsqrt.f32 %v229_v54 }
  0xc7   :  { %v197_v36 = vpop.xlane.xlu1 %196  ;;  %v194_v37 = vpop.xlane.xlu0 %193  ;;  %464 = vrsqrt.f32 %v228_v55 }
  0xc8   :  { %v231_v58 = vmax.f32 %v197_v36, 1e-16  ;;  %v230_v59 = vmax.f32 %v194_v37, 1e-16  ;;  %v455_v8 = vpop.eup %454 }
  0xc9   :  { %v457_v10 = vpop.eup %456 }
  0xca   :  { %466 = vrsqrt.f32 %v231_v58 }
  0xcb   :  { %v203_v38 = vpop.xlane.xlu1 %202  ;;  %v200_v39 = vpop.xlane.xlu0 %199  ;;  %468 = vrsqrt.f32 %v230_v59 }
  0xcc   :  { %v233_v60 = vmax.f32 %v203_v38, 1e-16  ;;  %v232_v62 = vmax.f32 %v200_v39, 1e-16  ;;  %v459_v12 = vpop.eup %458 }
  0xcd   :  { %v461_v15 = vpop.eup %460 }
  0xce   :  { %470 = vrsqrt.f32 %v233_v60 }
  0xcf   :  { %v209_v40 = vpop.xlane.xlu1 %208  ;;  %v206_v41 = vpop.xlane.xlu0 %205  ;;  %472 = vrsqrt.f32 %v232_v62 }
  0xd0   :  { %v235_v1 = vmax.f32 %v209_v40, 1e-16  ;;  %v234_v4 = vmax.f32 %v206_v41, 1e-16  ;;  %v463_v18 = vpop.eup %462 }
  0xd1   :  { %v465_v20 = vpop.eup %464 }
  0xd2   :  { %474 = vrsqrt.f32 %v235_v1 }
  0xd3   :  { %v215_v42 = vpop.xlane.xlu1 %214  ;;  %v212_v43 = vpop.xlane.xlu0 %211  ;;  %476 = vrsqrt.f32 %v234_v4 }
  0xd4   :  { %v237_v9 = vmax.f32 %v215_v42, 1e-16  ;;  %v236_v11 = vmax.f32 %v212_v43, 1e-16  ;;  %v467_v22 = vpop.eup %466 }
  0xd5   :  { %v469_v27 = vpop.eup %468 }
  0xd6   :  { %478 = vrsqrt.f32 %v237_v9 }
  0xd7   :  { %v718_v44 = vpop.xlane.xlu1 %220  ;;  %v720_v45 = vpop.xlane.xlu0 %217  ;;  %480 = vrsqrt.f32 %v236_v11 }
  0xd8   :  { %v239_v19 = vmax.f32 %v718_v44, 1e-16  ;;  %v238_v21 = vmax.f32 %v720_v45, 1e-16  ;;  %v471_v34 = vpop.eup %470 }
  0xd9   :  { %v473_v37 = vpop.eup %472 }
  0xda   :  { %482 = vrsqrt.f32 %v239_v19 }
  0xdb   :  { %v101_v50 = vpop.xlane.xlu1 %100  ;;  %v98_v51 = vpop.xlane.xlu0 %97  ;;  %484 = vrsqrt.f32 %v238_v21 }
  0xdc   :  { %v259_v28 = vmul.f32 %v457_v10, %v101_v50  ;;  %v258_v29 = vmul.f32 %v453_v0, %v98_v51  ;;  %v475_v40 = vpop.eup %474  ;;  %v279_v10 = vadd.s32 8, %v722_v13 }
  0xdd   :  { %v477_v45 = vpop.eup %476 }
  0xde   :  { %v313_v46 = vrot.slane %v259_v28, %v727_v23  ;;  %v308_v47 = vrot.slane %v258_v29, %v730_v24  ;;  %vm284_vm9 = vcmp.lt.s32.totalorder %v279_v10, 9 }
  0xdf   :  { %v107_v56 = vpop.xlane.xlu1 %106  ;;  %v104_v57 = vpop.xlane.xlu0 %103 }
  0xe0   :  { %v261_v25 = vmul.f32 %v455_v8, %v107_v56  ;;  %v260_v26 = vmul.f32 %v451_v5, %v104_v57  ;;  %v479_v58 = vpop.eup %478  ;;  %v315_v2 = vsel %vm314_vm1, %v313_v46, %v308_v47 }
  0xe1   :  { %v481_v62 = vpop.eup %480 }
  0xe2   :  { %v323_v41 = vrot.slane %v261_v25, %v727_v23  ;;  %v319_v42 = vrot.slane %v260_v26, %v730_v24 }
  0xe3   :  { %v113_v63 = vpop.xlane.xlu1 %112  ;;  %v110_v3 = vpop.xlane.xlu0 %109 }
  0xe4   :  { %v263_v30 = vmul.f32 %v459_v12, %v113_v63  ;;  %v262_v31 = vmul.f32 %v461_v15, %v110_v3  ;;  %v324_v59 = vsel %vm314_vm1, %v323_v41, %v319_v42  ;;  %v483_v11 = vpop.eup %482 }
  0xe5   :  { %v389_v8 = vsel %vm388_vm2, %v324_v59, %v315_v2 }
  0xe6   :  { %v332_v48 = vrot.slane %v263_v30, %v727_v23  ;;  %v328_v49 = vrot.slane %v262_v31, %v730_v24 }
  0xe7   :  { %v119_v6 = vpop.xlane.xlu1 %118  ;;  %v116_v7 = vpop.xlane.xlu0 %115 }
  0xe8   :  { %v265_v35 = vmul.f32 %v463_v18, %v119_v6  ;;  %v264_v36 = vmul.f32 %v465_v20, %v116_v7  ;;  %v333_v63 = vsel %vm314_vm1, %v332_v48, %v328_v49 }
  0xe9   :  { %v391_v12 = vsel %vm390_vm3, %v333_v63, %v389_v8 }
  0xea   :  { %v341_v52 = vrot.slane %v265_v35, %v727_v23  ;;  %v337_v53 = vrot.slane %v264_v36, %v730_v24 }
  0xeb   :  { %v125_v16 = vpop.xlane.xlu1 %124  ;;  %v122_v17 = vpop.xlane.xlu0 %121 }
  0xec   :  { %v267_v38 = vmul.f32 %v467_v22, %v125_v16  ;;  %v266_v39 = vmul.f32 %v469_v27, %v122_v17  ;;  %v342_v0 = vsel %vm314_vm1, %v341_v52, %v337_v53  ;;  %v485_v17 = vpop.eup %484 }
  0xed   :  { %v393_v18 = vsel %vm392_vm4, %v342_v0, %v391_v12 }
  0xee   :  { %v350_v56 = vrot.slane %v267_v38, %v727_v23  ;;  %v346_v57 = vrot.slane %v266_v39, %v730_v24 }
  0xef   :  { %v131_v32 = vpop.xlane.xlu1 %130  ;;  %v128_v33 = vpop.xlane.xlu0 %127 }
  0xf0   :  { %v269_v43 = vmul.f32 %v471_v34, %v131_v32  ;;  %v268_v44 = vmul.f32 %v473_v37, %v128_v33  ;;  %v351_v9 = vsel %vm314_vm1, %v350_v56, %v346_v57 }
  0xf1   :  { %v395_v13 = vsel %vm394_vm5, %v351_v9, %v393_v18 }
  0xf2   :  { %v359_v60 = vrot.slane %v269_v43, %v727_v23  ;;  %v355_v61 = vrot.slane %v268_v44, %v730_v24 }
  0xf3   :  { %v137_v50 = vpop.xlane.xlu1 %136  ;;  %v134_v51 = vpop.xlane.xlu0 %133 }
  0xf4   :  { %v271_v54 = vmul.f32 %v475_v40, %v137_v50  ;;  %v270_v55 = vmul.f32 %v477_v45, %v134_v51  ;;  %v360_v14 = vsel %vm314_vm1, %v359_v60, %v355_v61 }
  0xf5   :  { %v397_v27 = vsel %vm396_vm6, %v360_v14, %v395_v13 }
  0xf6   :  { %v368_v3 = vrot.slane %v271_v54, %v727_v23  ;;  %v364_v1 = vrot.slane %v270_v55, %v730_v24 }
  0xf7   :  { %v143_v4 = vpop.xlane.xlu1 %142  ;;  %v140_v5 = vpop.xlane.xlu0 %139 }
  0xf8   :  { %v273_v6 = vmul.f32 %v479_v58, %v143_v4  ;;  %v272_v7 = vmul.f32 %v481_v62, %v140_v5  ;;  %v369_v19 = vsel %vm314_vm1, %v368_v3, %v364_v1 }
  0xf9   :  { %v399_v30 = vsel %vm398_vm7, %v369_v19, %v397_v27 }
  0xfa   :  { %v377_v15 = vrot.slane %v273_v6, %v727_v23  ;;  %v373_v16 = vrot.slane %v272_v7, %v730_v24 }
  0xfb   :  { %v149_v20 = vpop.xlane.xlu1 %148  ;;  %v146_v21 = vpop.xlane.xlu0 %145 }
  0xfc   :  { %v275_v22 = vmul.f32 %v483_v11, %v149_v20  ;;  %v274_v25 = vmul.f32 %v485_v17, %v146_v21  ;;  %v378_v26 = vsel %vm314_vm1, %v377_v15, %v373_v16 }
  0xfd   :  { %v401_v31 = vsel %vm400_vm8, %v378_v26, %v399_v30 }
  0xfe   :  { %v386_v28 = vrot.slane %v275_v22, %v727_v23  ;;  %v382_v29 = vrot.slane %v274_v25, %v730_v24  ;;  %v408_v34 = vsel %vm407_vm10, %v401_v31, 0.0 }
 0x100   :  { %v387_v32 = vsel %vm314_vm1, %v386_v28, %v382_v29 }
 0x101   :  { %v405_v33 = vsel %vm284_vm9, %v387_v32, 0.0 }
 0x102   :  { %v410_v35 = vsel %vm409_vm11, %v405_v33, 0.0 }
 0x103   :  { %v411_v36 = vadd.f32 %v410_v35, %v408_v34 }
 0x105   :  { %412 = vadd.xlane.f32.xlu0 %v411_v36 }
 0x192   :  { %v413_v37 = vpop.xlane.xlu0 %412 }
 0x193   :  { %v414_v38 = vrot.slane %v413_v37, 4 }
 0x195   :  { %v415_v39 = vadd.f32 %v414_v38, %v413_v37 }
 0x197   :  { %v416_v40 = vrot.slane %v415_v39, 2 }
 0x199   :  { %v417_v41 = vadd.f32 %v416_v40, %v415_v39 }
 0x19b   :  { %v418_v23 = vrot.slane %v417_v41, 1 }
 0x19d   :  { %v419_v42 = vadd.f32 %v418_v23, %v417_v41 }
 0x19f   :  { %442 = vpush %v419_v42 }
 0x1d0   :  { %s443_s7 = spop %442 }
 0x1d1   :  { %v421_v24 = vstv %s443_s7 }
 0x1d2   :  { %423 = vst [vmem:[#allocation7] sm:$0xff] %v421_v24 }
 0x1d3   :  { %541 = shalt.err (!%p538_p6)
}
 0x1d4   :  { %s542_s11 = scalar_lea.hbm %s779_s2, 128 }
 0x1d5   :  { %p543_p7 = scmp.ne.s32.totalorder %s779_s2, %s542_s11  ;;  %p546_p8 = scmp.lt.u32.totalorder %s542_s11, %s779_s2 }
 0x1d7   :  { %p548_p9 = pnand %p546_p8, %p543_p7 }
 0x1d9   :  { %551 = shalt.err (!%p548_p9)
}
 0x1da   :  { %433 = dma.vmem_to_hbm [thread:$0]  %s431_s6, 128, %s779_s2, [#allocation4]  }
 0x1db   :  { %556 = dma.done.wait [#allocation4], 128  }
 0x1dc   :  { %557 = vsyncadd [#allocation4], 4294967168 }
 0x1dd   :  { %437 = vsyncpa [#allocation3], 1 }
 0x1de   :  { %438 = vsyncpa [#allocation6], 1 }
 0x1df   :  { %439 = vsyncpa [#allocation4], 1 }

</bundles_post_ra>
